<compile_context>
chip_gen: v7x
topology: tpu7x:2x2x1
jax: 0.10.0
libtpu: 0.0.40
codegen_flags: <defaults>
</compile_context>

<pallas_src>
import math

import numpy as np

import jax
import jax.numpy as jnp
from jax.experimental import pallas as pl
from jax.experimental.pallas import tpu as pltpu

_LOG_CLAMP = -100.0          # PyTorch BCELoss clamps log terms at -100
_LN2 = math.log(2.0)
_TD_MAX_LANES = 16384        # hard cap on lane-tile width
_BUF_BYTES = 1 << 20         # ~1 MiB target per input tile buffer


def _round_up(x, m):
    return ((x + m - 1) // m) * m


def _choose_row_split(n, d_pad):
    """Pick R so the kernel sees (n*R, d_pad//R) with n*R a multiple of 8
    (full (8,128) vreg occupancy) whenever d_pad/128 allows it."""
    k = d_pad // 128
    r = 8 // math.gcd(n, 8)          # smallest R with (n*R) % 8 == 0
    if r <= k and k % r == 0:
        return r
    return 1                         # fallback: still correct, lower occupancy


def _choose_td(cols, rows, itemsize):
    """Largest multiple-of-128 divisor of `cols` within the VMEM tile budget."""
    budget_lanes = max(128, (_BUF_BYTES // max(1, rows * itemsize)) // 128 * 128)
    cap = min(cols, _TD_MAX_LANES, budget_lanes) // 128
    k = cols // 128
    best = 1
    for m in range(1, cap + 1):
        if k % m == 0:
            best = m
    return best * 128


def bce_dice_loss(pred, target, binary_targets=False):
    """Fused BCE + (1 - Dice) loss. pred/target: same shape, pred in (0,1)."""
    assert pred.shape == target.shape
    n = pred.shape[0]
    d = int(np.prod(pred.shape[1:]))

    # Native-dtype, lane-dense layout; cast to f32 inside the kernel.
    p2 = pred.reshape(n, d)
    t2 = target.reshape(n, d)
    if t2.dtype == jnp.bool_:
        t2 = t2.astype(jnp.int8)

    # Minimal right-edge padding to a 128-lane multiple (no pad emitted when
    # d is already 128-aligned).  p=0.5 / t=0 padding is corrected exactly in
    # the scalar glue below, so the kernel needs no per-tile mask.
    d_pad = _round_up(d, 128)
    pad = d_pad - d
    if pad:
        p2 = jnp.pad(p2, ((0, 0), (0, pad)), constant_values=0.5)
        t2 = jnp.pad(t2, ((0, 0), (0, pad)), constant_values=0)

    # Re-view (n, d_pad) as (rows, cols) with rows a multiple of 8 when
    # possible -> full sublane occupancy even for tiny batch sizes.
    r_split = _choose_row_split(n, d_pad)
    rows = n * r_split
    cols = d_pad // r_split
    p2 = p2.reshape(rows, cols)
    t2 = t2.reshape(rows, cols)

    itemsize = max(jnp.dtype(p2.dtype).itemsize, jnp.dtype(t2.dtype).itemsize)
    td = _choose_td(cols, rows, itemsize)
    n_tiles = cols // td

    # Leading 'parallel' axis shards the column loop across TensorCores
    # (2 on v7x); per-part accumulators are combined in the glue.
    n_parts = 2 if (n_tiles % 2 == 0 and n_tiles >= 2) else 1
    tiles_per_part = n_tiles // n_parts

    def kernel(p_ref, t_ref, bce_ref, pt_ref, ps_ref, ts_ref):
        j = pl.program_id(1)

        @pl.when(j == 0)
        def _():
            bce_ref[...] = jnp.zeros_like(bce_ref)
            pt_ref[...] = jnp.zeros_like(pt_ref)
            ps_ref[...] = jnp.zeros_like(ps_ref)
            ts_ref[...] = jnp.zeros_like(ts_ref)

        p = p_ref[...].astype(jnp.float32)
        t = t_ref[...].astype(jnp.float32)

        if binary_targets:
            # One transcendental per element (valid only for 0/1 targets).
            bce = -jnp.maximum(jnp.log(jnp.where(t > 0.5, p, 1.0 - p)),
                               _LOG_CLAMP)
        else:
            logp = jnp.maximum(jnp.log(p), _LOG_CLAMP)
            log1mp = jnp.maximum(jnp.log(1.0 - p), _LOG_CLAMP)
            bce = -(t * logp + (1.0 - t) * log1mp)
        pt = p * t

        def lane_fold(x):          # (rows, td) -> (rows, 128) via VPU adds
            acc = x[:, 0:128]
            for c in range(1, td // 128):
                acc = acc + x[:, c * 128:(c + 1) * 128]
            return acc

        bce_ref[...] += lane_fold(bce)
        pt_ref[...] += lane_fold(pt)
        ps_ref[...] += lane_fold(p)
        ts_ref[...] += lane_fold(t)

    in_spec = pl.BlockSpec((rows, td),
                           lambda pi, j: (0, pi * tiles_per_part + j))
    acc_spec = pl.BlockSpec((None, rows, 128), lambda pi, j: (pi, 0, 0))
    acc_shape = jax.ShapeDtypeStruct((n_parts, rows, 128), jnp.float32)

    bce_l, pt_l, ps_l, ts_l = pl.pallas_call(
        kernel,
        out_shape=(acc_shape,) * 4,
        grid_spec=pltpu.PrefetchScalarGridSpec(
            num_scalar_prefetch=0,
            grid=(n_parts, tiles_per_part),
            in_specs=[in_spec, in_spec],
            out_specs=(acc_spec,) * 4),
        compiler_params=pltpu.CompilerParams(
            dimension_semantics=("parallel", "arbitrary")),
    )(p2, t2)

    # ---------------- tiny scalar glue (plain JAX) ----------------
    def fold_rows(x):              # (n_parts, rows, 128) -> (n,) per-row sums
        return jnp.sum(x, axis=(0, 2)).reshape(n, r_split).sum(axis=1)

    bce_rows = fold_rows(bce_l)
    pt_rows = fold_rows(pt_l)
    ps_rows = fold_rows(ps_l)
    ts_rows = fold_rows(ts_l)

    if pad:  # exact correction for the p=0.5 / t=0 padded columns
        bce_rows = bce_rows - pad * _LN2
        ps_rows = ps_rows - 0.5 * pad

    bce_mean = jnp.sum(bce_rows) / (n * d)             # BCELoss, reduction=mean
    scores = 2.0 * (pt_rows + 1.0) / (ps_rows + ts_rows + 1.0)
    dice_score = jnp.clip(jnp.sum(scores) / n, 0.0, 1.0)
    return bce_mean + (1.0 - dice_score)               # BCE + DiceLoss


# ---------------------------------------------------------------------------
# Pure-JAX reference (mirrors the PyTorch module) for a sanity check
# ---------------------------------------------------------------------------
def ref_bce_dice_loss(pred, target):
    n = pred.shape[0]
    p = pred.reshape(n, -1).astype(jnp.float32)
    t = target.reshape(n, -1).astype(jnp.float32)

    logp = jnp.maximum(jnp.log(p), _LOG_CLAMP)
    log1mp = jnp.maximum(jnp.log(1.0 - p), _LOG_CLAMP)
    bce = jnp.mean(-(t * logp + (1.0 - t) * log1mp))

    inter = jnp.sum(p * t, axis=1)
    scores = 2.0 * (inter + 1.0) / (jnp.sum(p, axis=1) + jnp.sum(t, axis=1) + 1.0)
    dice_score = jnp.clip(jnp.sum(scores) / n, 0.0, 1.0)
    return bce + (1.0 - dice_score)


# ---------------------------------------------------------------------------
if __name__ == "__main__":
    key = jax.random.PRNGKey(0)
    k1, k2 = jax.random.split(key)

    N, C, H, W = 2, 4, 16, 16
    preds = jax.nn.sigmoid(jax.random.normal(k1, (N, C, H, W), jnp.float32))
    trues = (jax.random.uniform(k2, (N, C, H, W)) > 0.5).astype(jnp.float32)

    loss = jax.block_until_ready(bce_dice_loss(preds, trues))
    assert loss.shape == (), loss.shape

    ref = jax.block_until_ready(ref_bce_dice_loss(preds, trues))
    np.testing.assert_allclose(np.asarray(loss), np.asarray(ref),
                               rtol=1e-5, atol=1e-5)

    print("KERNEL_OK")
</pallas_src>

<mosaic_0001>
module attributes {stable_mosaic.version = 11 : i64} {
  func.func @kernel(%arg0: i32, %arg1: i32, %arg2: memref<8x256xf32, #tpu.memory_space<vmem>>, %arg3: memref<8x256xf32, #tpu.memory_space<vmem>>, %arg4: memref<1x8x128xf32, #tpu.memory_space<vmem>>, %arg5: memref<1x8x128xf32, #tpu.memory_space<vmem>>, %arg6: memref<1x8x128xf32, #tpu.memory_space<vmem>>, %arg7: memref<1x8x128xf32, #tpu.memory_space<vmem>>) attributes {dimension_semantics = [#tpu.dimension_semantics<parallel>, #tpu.dimension_semantics<arbitrary>], iteration_bounds = array<i64: 1, 1>, scalar_prefetch = 0 : i64, scratch_operands = 0 : i64, tpu.core_type = #tpu.core_type<tc>, window_params = [{transform_indices = @transform_0, window_bounds = array<i64: 8, 256>}, {transform_indices = @transform_1, window_bounds = array<i64: 8, 256>}, {transform_indices = @transform_2, window_bounds = array<i64: 1, 8, 128>}, {transform_indices = @transform_3, window_bounds = array<i64: 1, 8, 128>}, {transform_indices = @transform_4, window_bounds = array<i64: 1, 8, 128>}, {transform_indices = @transform_5, window_bounds = array<i64: 1, 8, 128>}]} {
    %c0_i32 = arith.constant 0 : i32
    %0 = arith.cmpi eq, %arg1, %c0_i32 : i32
    %1 = arith.extui %0 : i1 to i32
    %c0_i32_0 = arith.constant 0 : i32
    %2 = arith.cmpi ne, %1, %c0_i32_0 : i32
    scf.if %2 {
      %cst_32 = arith.constant 0.000000e+00 : f32
      %57 = vector.broadcast %cst_32 : f32 to vector<8x128xf32>
      %c0_33 = arith.constant 0 : index
      %c0_34 = arith.constant 0 : index
      %c0_35 = arith.constant 0 : index
      %58 = vector.load %arg4[%c0_33, %c0_34, %c0_35] : memref<1x8x128xf32, #tpu.memory_space<vmem>>, vector<1x8x128xf32>
      %59 = vector.shape_cast %58 : vector<1x8x128xf32> to vector<8x128xf32>
      %60 = vector.shape_cast %57 : vector<8x128xf32> to vector<1x8x128xf32>
      tpu.vector_store %arg4[%c0_33, %c0_34, %c0_35], %60 {strides = array<i32>} : memref<1x8x128xf32, #tpu.memory_space<vmem>>, vector<1x8x128xf32>,
      %cst_36 = arith.constant 0.000000e+00 : f32
      %61 = vector.broadcast %cst_36 : f32 to vector<8x128xf32>
      %c0_37 = arith.constant 0 : index
      %c0_38 = arith.constant 0 : index
      %c0_39 = arith.constant 0 : index
      %62 = vector.load %arg5[%c0_37, %c0_38, %c0_39] : memref<1x8x128xf32, #tpu.memory_space<vmem>>, vector<1x8x128xf32>
      %63 = vector.shape_cast %62 : vector<1x8x128xf32> to vector<8x128xf32>
      %64 = vector.shape_cast %61 : vector<8x128xf32> to vector<1x8x128xf32>
      tpu.vector_store %arg5[%c0_37, %c0_38, %c0_39], %64 {strides = array<i32>} : memref<1x8x128xf32, #tpu.memory_space<vmem>>, vector<1x8x128xf32>,
      %cst_40 = arith.constant 0.000000e+00 : f32
      %65 = vector.broadcast %cst_40 : f32 to vector<8x128xf32>
      %c0_41 = arith.constant 0 : index
      %c0_42 = arith.constant 0 : index
      %c0_43 = arith.constant 0 : index
      %66 = vector.load %arg6[%c0_41, %c0_42, %c0_43] : memref<1x8x128xf32, #tpu.memory_space<vmem>>, vector<1x8x128xf32>
      %67 = vector.shape_cast %66 : vector<1x8x128xf32> to vector<8x128xf32>
      %68 = vector.shape_cast %65 : vector<8x128xf32> to vector<1x8x128xf32>
      tpu.vector_store %arg6[%c0_41, %c0_42, %c0_43], %68 {strides = array<i32>} : memref<1x8x128xf32, #tpu.memory_space<vmem>>, vector<1x8x128xf32>,
      %cst_44 = arith.constant 0.000000e+00 : f32
      %69 = vector.broadcast %cst_44 : f32 to vector<8x128xf32>
      %c0_45 = arith.constant 0 : index
      %c0_46 = arith.constant 0 : index
      %c0_47 = arith.constant 0 : index
      %70 = vector.load %arg7[%c0_45, %c0_46, %c0_47] : memref<1x8x128xf32, #tpu.memory_space<vmem>>, vector<1x8x128xf32>
      %71 = vector.shape_cast %70 : vector<1x8x128xf32> to vector<8x128xf32>
      %72 = vector.shape_cast %69 : vector<8x128xf32> to vector<1x8x128xf32>
      tpu.vector_store %arg7[%c0_45, %c0_46, %c0_47], %72 {strides = array<i32>} : memref<1x8x128xf32, #tpu.memory_space<vmem>>, vector<1x8x128xf32>,
    } else {
    }
    %c0 = arith.constant 0 : index
    %c0_1 = arith.constant 0 : index
    %3 = vector.load %arg2[%c0, %c0_1] : memref<8x256xf32, #tpu.memory_space<vmem>>, vector<8x256xf32>
    %c0_2 = arith.constant 0 : index
    %c0_3 = arith.constant 0 : index
    %4 = vector.load %arg3[%c0_2, %c0_3] : memref<8x256xf32, #tpu.memory_space<vmem>>, vector<8x256xf32>
    %5 = math.log %3 : vector<8x256xf32>
    %cst = arith.constant -1.000000e+02 : f32
    %6 = vector.broadcast %cst : f32 to vector<8x256xf32>
    %7 = arith.maximumf %5, %6 : vector<8x256xf32>
    %cst_4 = arith.constant 1.000000e+00 : f32
    %8 = vector.broadcast %cst_4 : f32 to vector<8x256xf32>
    %9 = arith.subf %8, %3 : vector<8x256xf32>
    %10 = math.log %9 : vector<8x256xf32>
    %cst_5 = arith.constant -1.000000e+02 : f32
    %11 = vector.broadcast %cst_5 : f32 to vector<8x256xf32>
    %12 = arith.maximumf %10, %11 : vector<8x256xf32>
    %13 = arith.mulf %4, %7 : vector<8x256xf32>
    %cst_6 = arith.constant 1.000000e+00 : f32
    %14 = vector.broadcast %cst_6 : f32 to vector<8x256xf32>
    %15 = arith.subf %14, %4 : vector<8x256xf32>
    %16 = arith.mulf %15, %12 : vector<8x256xf32>
    %17 = arith.addf %13, %16 : vector<8x256xf32>
    %cst_7 = arith.constant 0.000000e+00 : f32
    %18 = vector.broadcast %cst_7 : f32 to vector<8x256xf32>
    %19 = arith.subf %18, %17 : vector<8x256xf32>
    %20 = arith.mulf %3, %4 : vector<8x256xf32>
    %c0_8 = arith.constant 0 : index
    %c0_9 = arith.constant 0 : index
    %c0_10 = arith.constant 0 : index
    %21 = vector.load %arg4[%c0_8, %c0_9, %c0_10] : memref<1x8x128xf32, #tpu.memory_space<vmem>>, vector<1x8x128xf32>
    %22 = vector.shape_cast %21 : vector<1x8x128xf32> to vector<8x128xf32>
    %23 = vector.extract_strided_slice %19 {offsets = [0, 0], sizes = [8, 128], strides = [1, 1]} : vector<8x256xf32> to vector<8x128xf32>
    %24 = vector.extract_strided_slice %19 {offsets = [0, 128], sizes = [8, 128], strides = [1, 1]} : vector<8x256xf32> to vector<8x128xf32>
    %25 = arith.addf %23, %24 : vector<8x128xf32>
    %26 = arith.addf %22, %25 : vector<8x128xf32>
    %c0_11 = arith.constant 0 : index
    %c0_12 = arith.constant 0 : index
    %c0_13 = arith.constant 0 : index
    %27 = vector.load %arg4[%c0_11, %c0_12, %c0_13] : memref<1x8x128xf32, #tpu.memory_space<vmem>>, vector<1x8x128xf32>
    %28 = vector.shape_cast %27 : vector<1x8x128xf32> to vector<8x128xf32>
    %29 = vector.shape_cast %26 : vector<8x128xf32> to vector<1x8x128xf32>
    tpu.vector_store %arg4[%c0_11, %c0_12, %c0_13], %29 {strides = array<i32>} : memref<1x8x128xf32, #tpu.memory_space<vmem>>, vector<1x8x128xf32>,
    %c0_14 = arith.constant 0 : index
    %c0_15 = arith.constant 0 : index
    %c0_16 = arith.constant 0 : index
    %30 = vector.load %arg5[%c0_14, %c0_15, %c0_16] : memref<1x8x128xf32, #tpu.memory_space<vmem>>, vector<1x8x128xf32>
    %31 = vector.shape_cast %30 : vector<1x8x128xf32> to vector<8x128xf32>
    %32 = vector.extract_strided_slice %20 {offsets = [0, 0], sizes = [8, 128], strides = [1, 1]} : vector<8x256xf32> to vector<8x128xf32>
    %33 = vector.extract_strided_slice %20 {offsets = [0, 128], sizes = [8, 128], strides = [1, 1]} : vector<8x256xf32> to vector<8x128xf32>
    %34 = arith.addf %32, %33 : vector<8x128xf32>
    %35 = arith.addf %31, %34 : vector<8x128xf32>
    %c0_17 = arith.constant 0 : index
    %c0_18 = arith.constant 0 : index
    %c0_19 = arith.constant 0 : index
    %36 = vector.load %arg5[%c0_17, %c0_18, %c0_19] : memref<1x8x128xf32, #tpu.memory_space<vmem>>, vector<1x8x128xf32>
    %37 = vector.shape_cast %36 : vector<1x8x128xf32> to vector<8x128xf32>
    %38 = vector.shape_cast %35 : vector<8x128xf32> to vector<1x8x128xf32>
    tpu.vector_store %arg5[%c0_17, %c0_18, %c0_19], %38 {strides = array<i32>} : memref<1x8x128xf32, #tpu.memory_space<vmem>>, vector<1x8x128xf32>,
    %c0_20 = arith.constant 0 : index
    %c0_21 = arith.constant 0 : index
    %c0_22 = arith.constant 0 : index
    %39 = vector.load %arg6[%c0_20, %c0_21, %c0_22] : memref<1x8x128xf32, #tpu.memory_space<vmem>>, vector<1x8x128xf32>
    %40 = vector.shape_cast %39 : vector<1x8x128xf32> to vector<8x128xf32>
    %41 = vector.extract_strided_slice %3 {offsets = [0, 0], sizes = [8, 128], strides = [1, 1]} : vector<8x256xf32> to vector<8x128xf32>
    %42 = vector.extract_strided_slice %3 {offsets = [0, 128], sizes = [8, 128], strides = [1, 1]} : vector<8x256xf32> to vector<8x128xf32>
    %43 = arith.addf %41, %42 : vector<8x128xf32>
    %44 = arith.addf %40, %43 : vector<8x128xf32>
    %c0_23 = arith.constant 0 : index
    %c0_24 = arith.constant 0 : index
    %c0_25 = arith.constant 0 : index
    %45 = vector.load %arg6[%c0_23, %c0_24, %c0_25] : memref<1x8x128xf32, #tpu.memory_space<vmem>>, vector<1x8x128xf32>
    %46 = vector.shape_cast %45 : vector<1x8x128xf32> to vector<8x128xf32>
    %47 = vector.shape_cast %44 : vector<8x128xf32> to vector<1x8x128xf32>
    tpu.vector_store %arg6[%c0_23, %c0_24, %c0_25], %47 {strides = array<i32>} : memref<1x8x128xf32, #tpu.memory_space<vmem>>, vector<1x8x128xf32>,
    %c0_26 = arith.constant 0 : index
    %c0_27 = arith.constant 0 : index
    %c0_28 = arith.constant 0 : index
    %48 = vector.load %arg7[%c0_26, %c0_27, %c0_28] : memref<1x8x128xf32, #tpu.memory_space<vmem>>, vector<1x8x128xf32>
    %49 = vector.shape_cast %48 : vector<1x8x128xf32> to vector<8x128xf32>
    %50 = vector.extract_strided_slice %4 {offsets = [0, 0], sizes = [8, 128], strides = [1, 1]} : vector<8x256xf32> to vector<8x128xf32>
    %51 = vector.extract_strided_slice %4 {offsets = [0, 128], sizes = [8, 128], strides = [1, 1]} : vector<8x256xf32> to vector<8x128xf32>
    %52 = arith.addf %50, %51 : vector<8x128xf32>
    %53 = arith.addf %49, %52 : vector<8x128xf32>
    %c0_29 = arith.constant 0 : index
    %c0_30 = arith.constant 0 : index
    %c0_31 = arith.constant 0 : index
    %54 = vector.load %arg7[%c0_29, %c0_30, %c0_31] : memref<1x8x128xf32, #tpu.memory_space<vmem>>, vector<1x8x128xf32>
    %55 = vector.shape_cast %54 : vector<1x8x128xf32> to vector<8x128xf32>
    %56 = vector.shape_cast %53 : vector<8x128xf32> to vector<1x8x128xf32>
    tpu.vector_store %arg7[%c0_29, %c0_30, %c0_31], %56 {strides = array<i32>} : memref<1x8x128xf32, #tpu.memory_space<vmem>>, vector<1x8x128xf32>,
    return
  }
  func.func @transform_0(%arg0: i32, %arg1: i32) -> (i32, i32) {
    %c1_i32 = arith.constant 1 : i32
    %0 = arith.muli %arg0, %c1_i32 : i32
    %1 = arith.addi %0, %arg1 : i32
    %c0_i32 = arith.constant 0 : i32
    %c0_i32_0 = arith.constant 0 : i32
    return %c0_i32, %1 : i32, i32
  }
  func.func @transform_1(%arg0: i32, %arg1: i32) -> (i32, i32) {
    %c1_i32 = arith.constant 1 : i32
    %0 = arith.muli %arg0, %c1_i32 : i32
    %1 = arith.addi %0, %arg1 : i32
    %c0_i32 = arith.constant 0 : i32
    %c0_i32_0 = arith.constant 0 : i32
    return %c0_i32, %1 : i32, i32
  }
  func.func @transform_2(%arg0: i32, %arg1: i32) -> (i32, i32, i32) {
    %c0_i32 = arith.constant 0 : i32
    %c0_i32_0 = arith.constant 0 : i32
    %c0_i32_1 = arith.constant 0 : i32
    return %arg0, %c0_i32, %c0_i32_0 : i32, i32, i32
  }
  func.func @transform_3(%arg0: i32, %arg1: i32) -> (i32, i32, i32) {
    %c0_i32 = arith.constant 0 : i32
    %c0_i32_0 = arith.constant 0 : i32
    %c0_i32_1 = arith.constant 0 : i32
    return %arg0, %c0_i32, %c0_i32_0 : i32, i32, i32
  }
  func.func @transform_4(%arg0: i32, %arg1: i32) -> (i32, i32, i32) {
    %c0_i32 = arith.constant 0 : i32
    %c0_i32_0 = arith.constant 0 : i32
    %c0_i32_1 = arith.constant 0 : i32
    return %arg0, %c0_i32, %c0_i32_0 : i32, i32, i32
  }
  func.func @transform_5(%arg0: i32, %arg1: i32) -> (i32, i32, i32) {
    %c0_i32 = arith.constant 0 : i32
    %c0_i32_0 = arith.constant 0 : i32
    %c0_i32_1 = arith.constant 0 : i32
    return %arg0, %c0_i32, %c0_i32_0 : i32, i32, i32
  }
}

</mosaic_0001>

<bundles_post_ra>
// kernel: tpu_custom_call.1
= control target key start
LH: loop header
LB: loop body
LE: loop exit
PB: predicated region body
PF: predicated region fallthrough
CT: control target
= control target key end

     0   :  { %11 = vsyncpa [#allocation3], 0  ;;  %s456_s0 = inlined_call_operand.hbm [shape: f32[8,256], index: 0, kind: input, shape index: {}]   ;;  %s457_s1 = inlined_call_operand.hbm [shape: f32[8,256], index: 1, kind: input, shape index: {}]   ;;  %s458_s2 = inlined_call_operand.hbm [shape: f32[1,8,128], index: 2, kind: output, shape index: {0}]   ;;  %s459_s3 = inlined_call_operand.hbm [shape: f32[1,8,128], index: 3, kind: output, shape index: {1}]   ;;  %s460_s4 = inlined_call_operand.hbm [shape: f32[1,8,128], index: 4, kind: output, shape index: {2}]   ;;  %s461_s5 = inlined_call_operand.hbm [shape: f32[1,8,128], index: 5, kind: output, shape index: {3}]  }
   0x1   :  { %12 = vsyncpa [#allocation6], 0 }
   0x2   :  { %13 = vsyncpa [#allocation4], 0 }
   0x3   :  { %14 = vsyncpa [#allocation9], 0 }
   0x4   :  { %15 = vsyncpa [#allocation12], 0  ;;  %s322_s18 = smov [#allocation2]   ;;  %s323_s20 = smov [#allocation5]  }
   0x5   :  { %s26_s19 = sshll.u32 %s322_s18, 4  ;;  %s40_s21 = sshll.u32 %s323_s20, 4  ;;  %s27_s19 = int_to_ptr.vmem [resolvable:$true] %s26_s19  ;;  %s41_s21 = int_to_ptr.vmem [resolvable:$true] %s40_s21 }
   0x6   :  { %s180_s24 = scalar_lea.hbm %s456_s0, 256 }
   0x7   :  { %p181_p0 = scmp.ne.s32.totalorder %s456_s0, %s180_s24  ;;  %p184_p1 = scmp.lt.u32.totalorder %s180_s24, %s456_s0 }
   0x9   :  { %p186_p2 = pnand %p184_p1, %p181_p0 }
   0xb   :  { %189 = shalt.err (!%p186_p2)
}
   0xc   :  { %s190_s29 = scalar_lea.vmem %s27_s19, 256  ;;  %p195_p4 = scmp.lt.s32.totalorder %s27_s19, %s27_s19 }
   0xd   :  { %p191_p3 = scmp.ne.s32.totalorder %s27_s19, %s190_s29  ;;  %p196_p5 = scmp.lt.s32.totalorder %s190_s29, %s190_s29 }
   0xf   :  { %p197_p6 = por %p196_p5, %p195_p4 }
  0x11   :  { %p198_p7 = pnand %p197_p6, %p191_p3 }
  0x13   :  { %201 = shalt.err (!%p198_p7)
}
  0x14   :  { %29 = dma.hbm_to_vmem [thread:$0]  %s456_s0, 256, %s27_s19, [#allocation3]  }
  0x15   :  { %s202_s9 = scalar_lea.hbm %s457_s1, 256 }
  0x16   :  { %p203_p8 = scmp.ne.s32.totalorder %s457_s1, %s202_s9  ;;  %p206_p9 = scmp.lt.u32.totalorder %s202_s9, %s457_s1 }
  0x18   :  { %p208_p10 = pnand %p206_p9, %p203_p8 }
  0x1a   :  { %211 = shalt.err (!%p208_p10)
}
  0x1b   :  { %s212_s14 = scalar_lea.vmem %s41_s21, 256  ;;  %p217_p12 = scmp.lt.s32.totalorder %s41_s21, %s41_s21 }
  0x1c   :  { %p213_p11 = scmp.ne.s32.totalorder %s41_s21, %s212_s14  ;;  %p218_p13 = scmp.lt.s32.totalorder %s212_s14, %s212_s14 }
  0x1e   :  { %p219_p0 = por %p218_p13, %p217_p12 }
  0x20   :  { %p220_p1 = pnand %p219_p0, %p213_p11 }
  0x22   :  { %223 = shalt.err (!%p220_p1)
}
  0x23   :  { %43 = dma.hbm_to_vmem [thread:$0]  %s457_s1, 256, %s41_s21, [#allocation6]  }
  0x24   :  { %312 = dma.done.wait [#allocation3], 256  }
  0x25   :  { %313 = vsyncadd [#allocation3], 4294967040 }
  0x26   :  { %314 = dma.done.wait [#allocation6], 256  }
  0x27   :  { %315 = vsyncadd [#allocation6], 4294967040  ;;  %v62_v0 = vld [vmem:[#allocation2] sm:$0xff]  ;;  %v63_v1 = vld [vmem:[#allocation2 + $0x8] sm:$0xff]  ;;  %s324_s16 = smov [#allocation11]   ;;  %s325_s17 = smov [#allocation8]  }
  0x28   :  { %v382_v2 = vld [vmem:[#allocation5] sm:$0xff]  ;;  %v384_v3 = vld [vmem:[#allocation5 + $0x8] sm:$0xff]  ;;  %v72_v4 = vsub.f32 1.0, %v62_v0  ;;  %v73_v5 = vsub.f32 1.0, %v63_v1  ;;  %172 = vlog2.f32 %v62_v0  ;;  %s144_s1 = sshll.u32 %s324_s16, 4  ;;  %v101_v8 = vadd.f32 %v63_v1, %v62_v0  ;;  %s124_s18 = sshll.u32 %s325_s17, 4  ;;  %s145_s1 = int_to_ptr.vmem [resolvable:$true] %s144_s1  ;;  %s390_s18 = int_to_ptr.vmem [resolvable:$true] %s124_s18 }
  0x29   :  { %v90_v6 = vmul.f32 %v382_v2, %v62_v0  ;;  %v91_v7 = vmul.f32 %v384_v3, %v63_v1  ;;  %174 = vlog2.f32 %v63_v1  ;;  %v105_v9 = vadd.f32 %v384_v3, %v382_v2  ;;  %s326_s19 = smov [#allocation10]   ;;  %s224_s21 = scalar_lea.vmem %s145_s1, 128 }
  0x2a   :  { %176 = vlog2.f32 %v72_v4  ;;  %s134_s20 = sshll.u32 %s326_s19, 4  ;;  %103 = vst [vmem:[#allocation10] sm:$0xff] %v101_v8  ;;  %p225_p2 = scmp.ne.s32.totalorder %s145_s1, %s224_s21  ;;  %s392_s20 = int_to_ptr.vmem [resolvable:$true] %s134_s20 }
  0x2b   :  { %v97_v10 = vadd.f32 %v91_v7, %v90_v6  ;;  %178 = vlog2.f32 %v73_v5  ;;  %107 = vst [vmem:[#allocation11] sm:$0xff] %v105_v9  ;;  %p229_p3 = scmp.lt.s32.totalorder %s145_s1, %s145_s1  ;;  %p230_p4 = scmp.lt.s32.totalorder %s224_s21, %s224_s21 }
  0x2d   :  { %99 = vst [vmem:[#allocation8] sm:$0xff] %v97_v10  ;;  %p231_p5 = por %p230_p4, %p229_p3 }
  0x2f   :  { %p232_p6 = pnand %p231_p5, %p225_p2 }
  0x31   :  { %235 = shalt.err (!%p232_p6)
}
  0x32   :  { %s236_s24 = scalar_lea.hbm %s461_s5, 128 }
  0x33   :  { %p237_p7 = scmp.ne.s32.totalorder %s461_s5, %s236_s24  ;;  %p240_p8 = scmp.lt.u32.totalorder %s236_s24, %s461_s5 }
  0x35   :  { %p242_p9 = pnand %p240_p8, %p237_p7 }
  0x37   :  { %245 = shalt.err (!%p242_p9)
}
  0x38   :  { %147 = dma.vmem_to_hbm [thread:$0]  %s145_s1, 128, %s461_s5, [#allocation12]  }
  0x39   :  { %s246_s6 = scalar_lea.vmem %s390_s18, 128  ;;  %p251_p11 = scmp.lt.s32.totalorder %s390_s18, %s390_s18 }
  0x3a   :  { %p247_p10 = scmp.ne.s32.totalorder %s390_s18, %s246_s6  ;;  %p252_p12 = scmp.lt.s32.totalorder %s246_s6, %s246_s6 }
  0x3c   :  { %p253_p13 = por %p252_p12, %p251_p11 }
  0x3e   :  { %p254_p0 = pnand %p253_p13, %p247_p10 }
  0x40   :  { %257 = shalt.err (!%p254_p0)
}
  0x41   :  { %s258_s9 = scalar_lea.hbm %s459_s3, 128 }
  0x42   :  { %p259_p1 = scmp.ne.s32.totalorder %s459_s3, %s258_s9  ;;  %p262_p2 = scmp.lt.u32.totalorder %s258_s9, %s459_s3 }
  0x44   :  { %p264_p3 = pnand %p262_p2, %p259_p1 }
  0x46   :  { %267 = shalt.err (!%p264_p3)
}
  0x47   :  { %127 = dma.vmem_to_hbm [thread:$0]  %s390_s18, 128, %s459_s3, [#allocation9]  }
  0x48   :  { %s268_s0 = scalar_lea.vmem %s392_s20, 128  ;;  %p273_p5 = scmp.lt.s32.totalorder %s392_s20, %s392_s20 }
  0x49   :  { %p269_p4 = scmp.ne.s32.totalorder %s392_s20, %s268_s0  ;;  %p274_p6 = scmp.lt.s32.totalorder %s268_s0, %s268_s0 }
  0x4b   :  { %p275_p7 = por %p274_p6, %p273_p5 }
  0x4d   :  { %p276_p8 = pnand %p275_p7, %p269_p4 }
  0x4f   :  { %279 = shalt.err (!%p276_p8)
}
  0x50   :  { %s280_s1 = scalar_lea.hbm %s460_s4, 128 }
  0x51   :  { %p281_p9 = scmp.ne.s32.totalorder %s460_s4, %s280_s1  ;;  %p284_p10 = scmp.lt.u32.totalorder %s280_s1, %s460_s4 }
  0x53   :  { %p286_p11 = pnand %p284_p10, %p281_p9 }
  0x55   :  { %289 = shalt.err (!%p286_p11)
}
  0x56   :  { %137 = dma.vmem_to_hbm [thread:$0]  %s392_s20, 128, %s460_s4, [#allocation9]   ;;  %v173_v11 = vpop.eup %172  ;;  %v82_v19 = vsub.f32 1.0, %v382_v2  ;;  %v83_v22 = vsub.f32 1.0, %v384_v3 }
  0x57   :  { %v175_v12 = vpop.eup %174  ;;  %v67_v13 = vmul.f32 0.6931472, %v173_v11  ;;  %s327_s4 = smov [#allocation7]  }
  0x58   :  { %v177_v14 = vpop.eup %176  ;;  %v69_v15 = vmul.f32 0.6931472, %v175_v12  ;;  %s114_s20 = sshll.u32 %s327_s4, 4  ;;  %s115_s20 = int_to_ptr.vmem [resolvable:$true] %s114_s20 }
  0x59   :  { %v179_v16 = vpop.eup %178  ;;  %v70_v17 = vmax.f32 %v67_v13, -100.0  ;;  %v75_v18 = vmul.f32 0.6931472, %v177_v14  ;;  %s290_s23 = scalar_lea.vmem %s115_s20, 128  ;;  %p295_p13 = scmp.lt.s32.totalorder %s115_s20, %s115_s20 }
  0x5a   :  { %v71_v20 = vmax.f32 %v69_v15, -100.0  ;;  %v77_v21 = vmul.f32 0.6931472, %v179_v16  ;;  %p291_p12 = scmp.ne.s32.totalorder %s115_s20, %s290_s23  ;;  %p296_p0 = scmp.lt.s32.totalorder %s290_s23, %s290_s23 }
  0x5b   :  { %v78_v23 = vmax.f32 %v75_v18, -100.0  ;;  %v80_v24 = vmul.f32 %v70_v17, %v382_v2 }
  0x5c   :  { %v79_v25 = vmax.f32 %v77_v21, -100.0  ;;  %v81_v26 = vmul.f32 %v71_v20, %v384_v3  ;;  %p297_p1 = por %p296_p0, %p295_p13 }
  0x5d   :  { %v84_v27 = vmul.f32 %v82_v19, %v78_v23 }
  0x5e   :  { %v85_v28 = vmul.f32 %v83_v22, %v79_v25  ;;  %p298_p2 = pnand %p297_p1, %p291_p12 }
  0x5f   :  { %v86_v29 = vadd.f32 %v84_v27, %v80_v24 }
  0x60   :  { %v87_v30 = vadd.f32 %v85_v28, %v81_v26 }
  0x61   :  { %v88_v31 = vsub.f32 0.0, %v86_v29 }
  0x62   :  { %v89_v32 = vsub.f32 0.0, %v87_v30 }
  0x64   :  { %v93_v33 = vadd.f32 %v89_v32, %v88_v31 }
  0x66   :  { %95 = vst [vmem:[#allocation7] sm:$0xff] %v93_v33 }
  0x67   :  { %301 = shalt.err (!%p298_p2)
}
  0x68   :  { %s302_s26 = scalar_lea.hbm %s458_s2, 128 }
  0x69   :  { %p303_p3 = scmp.ne.s32.totalorder %s458_s2, %s302_s26  ;;  %p306_p4 = scmp.lt.u32.totalorder %s302_s26, %s458_s2 }
  0x6b   :  { %p308_p5 = pnand %p306_p4, %p303_p3 }
  0x6d   :  { %311 = shalt.err (!%p308_p5)
}
  0x6e   :  { %117 = dma.vmem_to_hbm [thread:$0]  %s115_s20, 128, %s458_s2, [#allocation4]  }
  0x6f   :  { %316 = dma.done.wait [#allocation4], 128  }
  0x70   :  { %317 = vsyncadd [#allocation4], 4294967168 }
  0x71   :  { %318 = dma.done.wait [#allocation9], 256  }
  0x72   :  { %319 = vsyncadd [#allocation9], 4294967040 }
  0x73   :  { %320 = dma.done.wait [#allocation12], 128  }
  0x74   :  { %321 = vsyncadd [#allocation12], 4294967168 }
  0x75   :  { %160 = vsyncpa [#allocation3], 1 }
  0x76   :  { %161 = vsyncpa [#allocation6], 1 }
  0x77   :  { %162 = vsyncpa [#allocation4], 1 }
  0x78   :  { %163 = vsyncpa [#allocation9], 1 }
  0x79   :  { %164 = vsyncpa [#allocation12], 1 }

</bundles_post_ra>
